<compile_context>
chip_gen: v7x
topology: tpu7x:2x2x1
jax: 0.10.0
libtpu: 0.0.40
codegen_flags: <defaults>
</compile_context>

<pallas_src>
import numpy as np
import jax
import jax.numpy as jnp
from jax import lax
from jax.experimental import pallas as pl
from jax.experimental.pallas import tpu as pltpu


_TM = 256     # M-chunk (contraction tile) for the MXU gather
_ROWS = 8     # coord rows padded 4 -> 8 (sublane-aligned; rows 4..7 are zero)


def _boxes_loss_kernel(nvalid_ref, nbinv_ref, sidx_ref, pred_ref, tgt_ref,
                       out_ref, acc_ref):
    k = pl.program_id(0)
    tm = pred_ref.shape[1]
    n_pad = sidx_ref.shape[1]

    @pl.when(k == 0)
    def _():
        acc_ref[...] = jnp.zeros_like(acc_ref)

    # ---- MXU one-hot gather of predicted boxes ------------------------------
    # sel[m, n] = 1 iff (global pred row k*tm + m) == src_idx[n].  Padded lanes
    # carry src_idx == -1 (no row matches) and padded pred rows never match a
    # valid index, so their contribution is exactly zero.
    idx = sidx_ref[...]                                           # [1, n_pad]
    row = lax.broadcasted_iota(jnp.int32, (tm, n_pad), 0) + k * tm
    sel = (row == idx).astype(jnp.float32)                        # [tm, n_pad]
    acc_ref[...] += jnp.dot(pred_ref[...], sel,
                            preferred_element_type=jnp.float32)   # [8, n_pad]

    # ---- epilogue: L1 + GIoU on the gathered pairs (last chunk only) --------
    @pl.when(k == pl.num_programs(0) - 1)
    def _():
        n_valid = nvalid_ref[0]          # int32, number of matched pairs
        inv_nb = nbinv_ref[0]            # f32, 1 / num_boxes
        lane = lax.broadcasted_iota(jnp.int32, (1, n_pad), 1)
        valid = lane < n_valid           # [1, n_pad]

        src = acc_ref[...]               # [8, n_pad] (rows 0..3 = cx, cy, w, h)
        tgt = tgt_ref[...]               # [8, n_pad]
        scx, scy, sw, sh = src[0:1], src[1:2], src[2:3], src[3:4]
        tcx, tcy, tw, th = tgt[0:1], tgt[1:2], tgt[2:3], tgt[3:4]

        # L1 loss (sum over the 4 cxcywh coords per pair)
        l1 = (jnp.abs(scx - tcx) + jnp.abs(scy - tcy) +
              jnp.abs(sw - tw) + jnp.abs(sh - th))                # [1, n_pad]

        # GIoU on matched pairs (diagonal)
        sx0, sy0 = scx - 0.5 * sw, scy - 0.5 * sh
        sx1, sy1 = scx + 0.5 * sw, scy + 0.5 * sh
        tx0, ty0 = tcx - 0.5 * tw, tcy - 0.5 * th
        tx1, ty1 = tcx + 0.5 * tw, tcy + 0.5 * th

        area_s = (sx1 - sx0) * (sy1 - sy0)
        area_t = (tx1 - tx0) * (ty1 - ty0)

        iw = jnp.maximum(jnp.minimum(sx1, tx1) - jnp.maximum(sx0, tx0), 0.0)
        ih = jnp.maximum(jnp.minimum(sy1, ty1) - jnp.maximum(sy0, ty0), 0.0)
        inter = iw * ih
        union = area_s + area_t - inter

        ew = jnp.maximum(jnp.maximum(sx1, tx1) - jnp.minimum(sx0, tx0), 0.0)
        eh = jnp.maximum(jnp.maximum(sy1, ty1) - jnp.minimum(sy0, ty0), 0.0)
        area_e = ew * eh

        # Valid lanes follow the eps-free PyTorch reference exactly (degenerate
        # boxes yield inf/nan there too); padded lanes get a harmless denom so
        # no NaN/Inf ever reaches the reductions.
        union_safe = jnp.where(valid, union, 1.0)
        area_e_safe = jnp.where(valid, area_e, 1.0)
        iou = inter / union_safe
        giou = iou - (area_e_safe - union_safe) / area_e_safe

        # Sum first, then a single scalar multiply by 1/num_boxes.
        out_ref[0] = jnp.sum(jnp.where(valid, l1, 0.0)) * inv_nb
        out_ref[1] = jnp.sum(jnp.where(valid, 1.0 - giou, 0.0)) * inv_nb


def boxes_loss(outputs, targets, indices, num_boxes, *, max_pairs=None):
    """Fused DETR BoxesLoss.

    `indices` (Hungarian matcher output) and `targets` are host-side objects
    in a real pipeline; index plumbing and the target gather are done with
    numpy and never force a device sync.  Pass a fixed `max_pairs` to pin the
    padded pair capacity and avoid step-to-step recompiles.
    """
    pred_boxes = outputs["pred_boxes"]                       # [B, Q, 4] cxcywh
    b, q, _ = pred_boxes.shape
    m = b * q
    m_pad = max(_TM, -(-m // _TM) * _TM)
    kt = m_pad // _TM

    # ---- host-side index plumbing + target gather ---------------------------
    src_list, tgt_rows = [], []
    for i, (s, t) in enumerate(indices):
        s = np.asarray(s, dtype=np.int32)
        t = np.asarray(t, dtype=np.int64)
        src_list.append(i * q + s)                           # flat row in [B*Q]
        tgt_rows.append(np.asarray(targets[i]["boxes"], dtype=np.float32)[t])
    src_flat = (np.concatenate(src_list) if src_list
                else np.zeros((0,), np.int32)).astype(np.int32)
    tgt_cat = (np.concatenate(tgt_rows, axis=0) if tgt_rows
               else np.zeros((0, 4), np.float32))            # [n, 4]

    n = int(src_flat.size)
    cap = n if max_pairs is None else max(int(max_pairs), n)
    n_pad = max(128, -(-cap // 128) * 128)                   # fixed cap -> no recompile

    src_idx = np.full((1, n_pad), -1, np.int32)
    src_idx[0, :n] = src_flat
    tgt_t = np.zeros((_ROWS, n_pad), np.float32)             # [8, n_pad]
    tgt_t[:4, :n] = tgt_cat.T                                # coords on sublanes

    # ---- lane-dense [8, M_pad] layout for predicted boxes (device tensor) ---
    pred_t = jnp.transpose(pred_boxes.reshape(m, 4).astype(jnp.float32))  # [4, M]
    pred_t = jnp.pad(pred_t, ((0, _ROWS - 4), (0, m_pad - m)))            # [8, M_pad]

    n_valid = jnp.full((1,), n, jnp.int32)
    # Precomputed reciprocal -> only a scalar multiply in the kernel epilogue.
    inv_nb = jnp.asarray(1.0 / num_boxes, jnp.float32).reshape(1)

    out = pl.pallas_call(
        _boxes_loss_kernel,
        out_shape=jax.ShapeDtypeStruct((2,), jnp.float32),
        grid=(kt,),
        in_specs=[
            pl.BlockSpec(memory_space=pltpu.MemorySpace.SMEM),   # n_valid
            pl.BlockSpec(memory_space=pltpu.MemorySpace.SMEM),   # 1 / num_boxes
            pl.BlockSpec((1, n_pad), lambda k: (0, 0)),          # src flat idx
            pl.BlockSpec((_ROWS, _TM), lambda k: (0, k)),        # pred [8, M_pad]
            pl.BlockSpec((_ROWS, n_pad), lambda k: (0, 0)),      # tgt  [8, n_pad]
        ],
        out_specs=pl.BlockSpec(memory_space=pltpu.MemorySpace.SMEM),
        scratch_shapes=[pltpu.VMEM((_ROWS, n_pad), jnp.float32)],
        compiler_params=pltpu.CompilerParams(
            dimension_semantics=("arbitrary",)),                 # M is a reduction
    )(n_valid, inv_nb, jnp.asarray(src_idx), pred_t, jnp.asarray(tgt_t))

    return {"loss_bbox": out[0], "loss_giou": out[1]}


# ----------------------------- pure-JAX reference -----------------------------
def _ref_boxes_loss(src, tgt, num_boxes):
    def to_xyxy(bx):
        cx, cy, w, h = bx[:, 0], bx[:, 1], bx[:, 2], bx[:, 3]
        return jnp.stack([cx - 0.5 * w, cy - 0.5 * h, cx + 0.5 * w, cy + 0.5 * h], -1)

    loss_bbox = jnp.sum(jnp.abs(src - tgt)) / num_boxes
    s, t = to_xyxy(src), to_xyxy(tgt)
    area_s = (s[:, 2] - s[:, 0]) * (s[:, 3] - s[:, 1])
    area_t = (t[:, 2] - t[:, 0]) * (t[:, 3] - t[:, 1])
    lt = jnp.maximum(s[:, :2], t[:, :2])
    rb = jnp.minimum(s[:, 2:], t[:, 2:])
    wh = jnp.clip(rb - lt, 0.0)
    inter = wh[:, 0] * wh[:, 1]
    union = area_s + area_t - inter
    iou = inter / union
    lt_e = jnp.minimum(s[:, :2], t[:, :2])
    rb_e = jnp.maximum(s[:, 2:], t[:, 2:])
    wh_e = jnp.clip(rb_e - lt_e, 0.0)
    area_e = wh_e[:, 0] * wh_e[:, 1]
    giou = iou - (area_e - union) / area_e
    loss_giou = jnp.sum(1.0 - giou) / num_boxes
    return loss_bbox, loss_giou


if __name__ == "__main__":
    key = jax.random.PRNGKey(0)
    k1, k2, k3 = jax.random.split(key, 3)

    # outputs['pred_boxes']: [batch=2, num_queries=8, 4] cxcywh in (0, 1)
    pred_boxes = jax.nn.sigmoid(jax.random.normal(k1, (2, 8, 4), jnp.float32))

    # targets: per-image ground-truth boxes (cxcywh in (0, 1)); in a real
    # pipeline these come from the (host-side) data loader.
    tgt_boxes_0 = jax.nn.sigmoid(jax.random.normal(k2, (4, 4), jnp.float32))
    tgt_boxes_1 = jax.nn.sigmoid(jax.random.normal(k3, (3, 4), jnp.float32))
    targets = [{"boxes": tgt_boxes_0}, {"boxes": tgt_boxes_1}]

    # matcher output: (src_query_idx, tgt_box_idx) per image — kept as numpy
    # (host-side, as the Hungarian matcher produces) to avoid device syncs.
    indices = [
        (np.array([1, 3, 5], np.int32), np.array([0, 2, 1], np.int32)),
        (np.array([0, 4], np.int32), np.array([1, 0], np.int32)),
    ]
    num_boxes = float(sum(int(s.shape[0]) for s, _ in indices))

    losses = boxes_loss({"pred_boxes": pred_boxes}, targets, indices, num_boxes,
                        max_pairs=128)
    jax.block_until_ready(losses)

    # reference: explicit gather + concat (mirrors the PyTorch module)
    batch_idx = jnp.concatenate(
        [jnp.full(s.shape, i, jnp.int32) for i, (s, _) in enumerate(indices)])
    src_q_idx = jnp.concatenate([jnp.asarray(s, jnp.int32) for s, _ in indices])
    src_ref = pred_boxes[batch_idx, src_q_idx]
    tgt_ref = jnp.concatenate(
        [t["boxes"][jnp.asarray(i, jnp.int32)] for t, (_, i) in zip(targets, indices)],
        axis=0)
    ref_bbox, ref_giou = _ref_boxes_loss(src_ref, tgt_ref, num_boxes)

    assert jnp.allclose(losses["loss_bbox"], ref_bbox, rtol=1e-5, atol=1e-5), (
        losses["loss_bbox"], ref_bbox)
    assert jnp.allclose(losses["loss_giou"], ref_giou, rtol=1e-5, atol=1e-5), (
        losses["loss_giou"], ref_giou)

    print("KERNEL_OK")
</pallas_src>

<mosaic_0001>
module attributes {stable_mosaic.version = 11 : i64} {
  func.func @_boxes_loss_kernel(%arg0: i32, %arg1: memref<1xi32, #tpu.memory_space<smem>>, %arg2: memref<1xf32, #tpu.memory_space<smem>>, %arg3: memref<1x128xi32, #tpu.memory_space<vmem>>, %arg4: memref<8x256xf32, #tpu.memory_space<vmem>>, %arg5: memref<8x128xf32, #tpu.memory_space<vmem>>, %arg6: memref<2xf32, #tpu.memory_space<smem>>, %arg7: memref<8x128xf32, #tpu.memory_space<vmem>>) attributes {dimension_semantics = [#tpu.dimension_semantics<arbitrary>], iteration_bounds = array<i64: 1>, scalar_prefetch = 0 : i64, scratch_operands = 1 : i64, tpu.core_type = #tpu.core_type<tc>, window_params = [{transform_indices = @transform_0, window_bounds = array<i64: 1>}, {transform_indices = @transform_1, window_bounds = array<i64: 1>}, {pipeline_mode = #tpu.pipeline_mode<synchronous>, transform_indices = @transform_2, window_bounds = array<i64: 1, 128>}, {transform_indices = @transform_3, window_bounds = array<i64: 8, 256>}, {pipeline_mode = #tpu.pipeline_mode<synchronous>, transform_indices = @transform_4, window_bounds = array<i64: 8, 128>}, {transform_indices = @transform_5, window_bounds = array<i64: 2>}]} {
    %c0_i32 = arith.constant 0 : i32
    %0 = arith.cmpi eq, %arg0, %c0_i32 : i32
    %1 = arith.extui %0 : i1 to i32
    %c0_i32_0 = arith.constant 0 : i32
    %2 = arith.cmpi ne, %1, %c0_i32_0 : i32
    scf.if %2 {
      %cst_10 = arith.constant 0.000000e+00 : f32
      %20 = vector.broadcast %cst_10 : f32 to vector<8x128xf32>
      %c0_11 = arith.constant 0 : index
      %c0_12 = arith.constant 0 : index
      %21 = vector.load %arg7[%c0_11, %c0_12] : memref<8x128xf32, #tpu.memory_space<vmem>>, vector<8x128xf32>
      tpu.vector_store %arg7[%c0_11, %c0_12], %20 {strides = array<i32>} : memref<8x128xf32, #tpu.memory_space<vmem>>, vector<8x128xf32>,
    } else {
    }
    %c0 = arith.constant 0 : index
    %c0_1 = arith.constant 0 : index
    %3 = vector.load %arg3[%c0, %c0_1] : memref<1x128xi32, #tpu.memory_space<vmem>>, vector<1x128xi32>
    %4 = tpu.iota {dimensions = array<i32: 0>} : vector<256x128xi32>
    %c256_i32 = arith.constant 256 : i32
    %5 = arith.muli %arg0, %c256_i32 : i32
    %6 = vector.broadcast %5 : i32 to vector<256x128xi32>
    %7 = arith.addi %4, %6 : vector<256x128xi32>
    %8 = vector.broadcast %3 : vector<1x128xi32> to vector<256x128xi32>
    %9 = arith.cmpi eq, %7, %8 : vector<256x128xi32>
    %10 = arith.extui %9 : vector<256x128xi1> to vector<256x128xi32>
    %11 = arith.sitofp %10 : vector<256x128xi32> to vector<256x128xf32>
    %c0_2 = arith.constant 0 : index
    %c0_3 = arith.constant 0 : index
    %12 = vector.load %arg7[%c0_2, %c0_3] : memref<8x128xf32, #tpu.memory_space<vmem>>, vector<8x128xf32>
    %c0_4 = arith.constant 0 : index
    %c0_5 = arith.constant 0 : index
    %13 = vector.load %arg4[%c0_4, %c0_5] : memref<8x256xf32, #tpu.memory_space<vmem>>, vector<8x256xf32>
    %cst = arith.constant dense<0.000000e+00> : vector<8x128xf32>
    %14 = tpu.matmul %13, %11, %cst {dimension_numbers = #tpu.dot_dimension_numbers<[1], [0], [0], [1], [0, 0, 1, 1], [], []>} : vector<8x256xf32>, vector<256x128xf32>, vector<8x128xf32> -> vector<8x128xf32>
    %15 = arith.addf %12, %14 : vector<8x128xf32>
    %c0_6 = arith.constant 0 : index
    %c0_7 = arith.constant 0 : index
    %16 = vector.load %arg7[%c0_6, %c0_7] : memref<8x128xf32, #tpu.memory_space<vmem>>, vector<8x128xf32>
    tpu.vector_store %arg7[%c0_6, %c0_7], %15 {strides = array<i32>} : memref<8x128xf32, #tpu.memory_space<vmem>>, vector<8x128xf32>,
    %c0_i32_8 = arith.constant 0 : i32
    %17 = arith.cmpi eq, %arg0, %c0_i32_8 : i32
    %18 = arith.extui %17 : i1 to i32
    %c0_i32_9 = arith.constant 0 : i32
    %19 = arith.cmpi ne, %18, %c0_i32_9 : i32
    scf.if %19 {
      %c0_10 = arith.constant 0 : index
      %20 = memref.load %arg1[%c0_10] : memref<1xi32, #tpu.memory_space<smem>>
      %c0_11 = arith.constant 0 : index
      %21 = memref.load %arg2[%c0_11] : memref<1xf32, #tpu.memory_space<smem>>
      %22 = tpu.iota {dimensions = array<i32: 1>} : vector<1x128xi32>
      %23 = vector.broadcast %20 : i32 to vector<1x128xi32>
      %24 = arith.cmpi slt, %22, %23 : vector<1x128xi32>
      %c0_12 = arith.constant 0 : index
      %c0_13 = arith.constant 0 : index
      %25 = vector.load %arg7[%c0_12, %c0_13] : memref<8x128xf32, #tpu.memory_space<vmem>>, vector<8x128xf32>
      %c0_14 = arith.constant 0 : index
      %c0_15 = arith.constant 0 : index
      %26 = vector.load %arg5[%c0_14, %c0_15] : memref<8x128xf32, #tpu.memory_space<vmem>>, vector<8x128xf32>
      %27 = vector.extract_strided_slice %25 {offsets = [0, 0], sizes = [1, 128], strides = [1, 1]} : vector<8x128xf32> to vector<1x128xf32>
      %28 = vector.extract_strided_slice %25 {offsets = [1, 0], sizes = [1, 128], strides = [1, 1]} : vector<8x128xf32> to vector<1x128xf32>
      %29 = vector.extract_strided_slice %25 {offsets = [2, 0], sizes = [1, 128], strides = [1, 1]} : vector<8x128xf32> to vector<1x128xf32>
      %30 = vector.extract_strided_slice %25 {offsets = [3, 0], sizes = [1, 128], strides = [1, 1]} : vector<8x128xf32> to vector<1x128xf32>
      %31 = vector.extract_strided_slice %26 {offsets = [0, 0], sizes = [1, 128], strides = [1, 1]} : vector<8x128xf32> to vector<1x128xf32>
      %32 = vector.extract_strided_slice %26 {offsets = [1, 0], sizes = [1, 128], strides = [1, 1]} : vector<8x128xf32> to vector<1x128xf32>
      %33 = vector.extract_strided_slice %26 {offsets = [2, 0], sizes = [1, 128], strides = [1, 1]} : vector<8x128xf32> to vector<1x128xf32>
      %34 = vector.extract_strided_slice %26 {offsets = [3, 0], sizes = [1, 128], strides = [1, 1]} : vector<8x128xf32> to vector<1x128xf32>
      %35 = arith.subf %27, %31 : vector<1x128xf32>
      %36 = math.absf %35 : vector<1x128xf32>
      %37 = arith.subf %28, %32 : vector<1x128xf32>
      %38 = math.absf %37 : vector<1x128xf32>
      %39 = arith.addf %36, %38 : vector<1x128xf32>
      %40 = arith.subf %29, %33 : vector<1x128xf32>
      %41 = math.absf %40 : vector<1x128xf32>
      %42 = arith.addf %39, %41 : vector<1x128xf32>
      %43 = arith.subf %30, %34 : vector<1x128xf32>
      %44 = math.absf %43 : vector<1x128xf32>
      %45 = arith.addf %42, %44 : vector<1x128xf32>
      %cst_16 = arith.constant 5.000000e-01 : f32
      %46 = vector.broadcast %cst_16 : f32 to vector<1x128xf32>
      %47 = arith.mulf %46, %29 : vector<1x128xf32>
      %48 = arith.subf %27, %47 : vector<1x128xf32>
      %cst_17 = arith.constant 5.000000e-01 : f32
      %49 = vector.broadcast %cst_17 : f32 to vector<1x128xf32>
      %50 = arith.mulf %49, %30 : vector<1x128xf32>
      %51 = arith.subf %28, %50 : vector<1x128xf32>
      %cst_18 = arith.constant 5.000000e-01 : f32
      %52 = vector.broadcast %cst_18 : f32 to vector<1x128xf32>
      %53 = arith.mulf %52, %29 : vector<1x128xf32>
      %54 = arith.addf %27, %53 : vector<1x128xf32>
      %cst_19 = arith.constant 5.000000e-01 : f32
      %55 = vector.broadcast %cst_19 : f32 to vector<1x128xf32>
      %56 = arith.mulf %55, %30 : vector<1x128xf32>
      %57 = arith.addf %28, %56 : vector<1x128xf32>
      %cst_20 = arith.constant 5.000000e-01 : f32
      %58 = vector.broadcast %cst_20 : f32 to vector<1x128xf32>
      %59 = arith.mulf %58, %33 : vector<1x128xf32>
      %60 = arith.subf %31, %59 : vector<1x128xf32>
      %cst_21 = arith.constant 5.000000e-01 : f32
      %61 = vector.broadcast %cst_21 : f32 to vector<1x128xf32>
      %62 = arith.mulf %61, %34 : vector<1x128xf32>
      %63 = arith.subf %32, %62 : vector<1x128xf32>
      %cst_22 = arith.constant 5.000000e-01 : f32
      %64 = vector.broadcast %cst_22 : f32 to vector<1x128xf32>
      %65 = arith.mulf %64, %33 : vector<1x128xf32>
      %66 = arith.addf %31, %65 : vector<1x128xf32>
      %cst_23 = arith.constant 5.000000e-01 : f32
      %67 = vector.broadcast %cst_23 : f32 to vector<1x128xf32>
      %68 = arith.mulf %67, %34 : vector<1x128xf32>
      %69 = arith.addf %32, %68 : vector<1x128xf32>
      %70 = arith.subf %54, %48 : vector<1x128xf32>
      %71 = arith.subf %57, %51 : vector<1x128xf32>
      %72 = arith.mulf %70, %71 : vector<1x128xf32>
      %73 = arith.subf %66, %60 : vector<1x128xf32>
      %74 = arith.subf %69, %63 : vector<1x128xf32>
      %75 = arith.mulf %73, %74 : vector<1x128xf32>
      %76 = arith.minimumf %54, %66 : vector<1x128xf32>
      %77 = arith.maximumf %48, %60 : vector<1x128xf32>
      %78 = arith.subf %76, %77 : vector<1x128xf32>
      %cst_24 = arith.constant 0.000000e+00 : f32
      %79 = vector.broadcast %cst_24 : f32 to vector<1x128xf32>
      %80 = arith.maximumf %78, %79 : vector<1x128xf32>
      %81 = arith.minimumf %57, %69 : vector<1x128xf32>
      %82 = arith.maximumf %51, %63 : vector<1x128xf32>
      %83 = arith.subf %81, %82 : vector<1x128xf32>
      %cst_25 = arith.constant 0.000000e+00 : f32
      %84 = vector.broadcast %cst_25 : f32 to vector<1x128xf32>
      %85 = arith.maximumf %83, %84 : vector<1x128xf32>
      %86 = arith.mulf %80, %85 : vector<1x128xf32>
      %87 = arith.addf %72, %75 : vector<1x128xf32>
      %88 = arith.subf %87, %86 : vector<1x128xf32>
      %89 = arith.maximumf %54, %66 : vector<1x128xf32>
      %90 = arith.minimumf %48, %60 : vector<1x128xf32>
      %91 = arith.subf %89, %90 : vector<1x128xf32>
      %cst_26 = arith.constant 0.000000e+00 : f32
      %92 = vector.broadcast %cst_26 : f32 to vector<1x128xf32>
      %93 = arith.maximumf %91, %92 : vector<1x128xf32>
      %94 = arith.maximumf %57, %69 : vector<1x128xf32>
      %95 = arith.minimumf %51, %63 : vector<1x128xf32>
      %96 = arith.subf %94, %95 : vector<1x128xf32>
      %cst_27 = arith.constant 0.000000e+00 : f32
      %97 = vector.broadcast %cst_27 : f32 to vector<1x128xf32>
      %98 = arith.maximumf %96, %97 : vector<1x128xf32>
      %99 = arith.mulf %93, %98 : vector<1x128xf32>
      %cst_28 = arith.constant 1.000000e+00 : f32
      %100 = vector.broadcast %cst_28 : f32 to vector<1x128xf32>
      %101 = arith.select %24, %88, %100 : vector<1x128xi1>, vector<1x128xf32>
      %cst_29 = arith.constant 1.000000e+00 : f32
      %102 = vector.broadcast %cst_29 : f32 to vector<1x128xf32>
      %103 = arith.select %24, %99, %102 : vector<1x128xi1>, vector<1x128xf32>
      %104 = arith.divf %86, %101 : vector<1x128xf32>
      %105 = arith.subf %103, %101 : vector<1x128xf32>
      %106 = arith.divf %105, %103 : vector<1x128xf32>
      %107 = arith.subf %104, %106 : vector<1x128xf32>
      %cst_30 = arith.constant 0.000000e+00 : f32
      %108 = vector.broadcast %cst_30 : f32 to vector<1x128xf32>
      %109 = arith.select %24, %45, %108 : vector<1x128xi1>, vector<1x128xf32>
      %110 = vector.shape_cast %109 : vector<1x128xf32> to vector<1x1x128xf32>
      %cst_31 = arith.constant dense<0.000000e+00> : vector<1xf32>
      %111 = vector.multi_reduction <add>, %110, %cst_31 [1, 2] : vector<1x1x128xf32> to vector<1xf32>
      %112 = vector.shape_cast %111 : vector<1xf32> to vector<1x1x1xf32>
      %113 = vector.extract %112[0, 0, 0] : f32 from vector<1x1x1xf32>
      %114 = arith.mulf %113, %21 : f32
      %c0_32 = arith.constant 0 : index
      %115 = memref.load %arg6[%c0_32] : memref<2xf32, #tpu.memory_space<smem>>
      memref.store %114, %arg6[%c0_32] : memref<2xf32, #tpu.memory_space<smem>>
      %cst_33 = arith.constant 1.000000e+00 : f32
      %116 = vector.broadcast %cst_33 : f32 to vector<1x128xf32>
      %117 = arith.subf %116, %107 : vector<1x128xf32>
      %cst_34 = arith.constant 0.000000e+00 : f32
      %118 = vector.broadcast %cst_34 : f32 to vector<1x128xf32>
      %119 = arith.select %24, %117, %118 : vector<1x128xi1>, vector<1x128xf32>
      %120 = vector.shape_cast %119 : vector<1x128xf32> to vector<1x1x128xf32>
      %cst_35 = arith.constant dense<0.000000e+00> : vector<1xf32>
      %121 = vector.multi_reduction <add>, %120, %cst_35 [1, 2] : vector<1x1x128xf32> to vector<1xf32>
      %122 = vector.shape_cast %121 : vector<1xf32> to vector<1x1x1xf32>
      %123 = vector.extract %122[0, 0, 0] : f32 from vector<1x1x1xf32>
      %124 = arith.mulf %123, %21 : f32
      %c1 = arith.constant 1 : index
      %125 = memref.load %arg6[%c1] : memref<2xf32, #tpu.memory_space<smem>>
      memref.store %124, %arg6[%c1] : memref<2xf32, #tpu.memory_space<smem>>
    } else {
    }
    return
  }
  func.func @transform_0(%arg0: i32) -> i32 {
    %c0_i32 = arith.constant 0 : i32
    %c0_i32_0 = arith.constant 0 : i32
    return %c0_i32 : i32
  }
  func.func @transform_1(%arg0: i32) -> i32 {
    %c0_i32 = arith.constant 0 : i32
    %c0_i32_0 = arith.constant 0 : i32
    return %c0_i32 : i32
  }
  func.func @transform_2(%arg0: i32) -> (i32, i32) {
    %c0_i32 = arith.constant 0 : i32
    %c0_i32_0 = arith.constant 0 : i32
    %c0_i32_1 = arith.constant 0 : i32
    return %c0_i32, %c0_i32_0 : i32, i32
  }
  func.func @transform_3(%arg0: i32) -> (i32, i32) {
    %c0_i32 = arith.constant 0 : i32
    %c0_i32_0 = arith.constant 0 : i32
    return %c0_i32, %arg0 : i32, i32
  }
  func.func @transform_4(%arg0: i32) -> (i32, i32) {
    %c0_i32 = arith.constant 0 : i32
    %c0_i32_0 = arith.constant 0 : i32
    %c0_i32_1 = arith.constant 0 : i32
    return %c0_i32, %c0_i32_0 : i32, i32
  }
  func.func @transform_5(%arg0: i32) -> i32 {
    %c0_i32 = arith.constant 0 : i32
    %c0_i32_0 = arith.constant 0 : i32
    return %c0_i32 : i32
  }
}

</mosaic_0001>

<bundles_post_ra>
// kernel: tpu_custom_call.1
= control target key start
LH: loop header
LB: loop body
LE: loop exit
PB: predicated region body
PF: predicated region fallthrough
CT: control target
= control target key end

     0   :  { %12 = vsyncpa [#allocation6], 0  ;;  %s749_s0 = inlined_call_operand.<no memory space> [shape: s32[1], index: 0, kind: input, shape index: {}]   ;;  %s750_s1 = inlined_call_operand.<no memory space> [shape: f32[1], index: 1, kind: input, shape index: {}]   ;;  %s751_s2 = inlined_call_operand.vmem [shape: s32[1,128], index: 2, kind: input, shape index: {}]   ;;  %s752_s3 = inlined_call_operand.hbm [shape: f32[8,256], index: 3, kind: input, shape index: {}]   ;;  %s753_s4 = inlined_call_operand.vmem [shape: f32[8,128], index: 4, kind: input, shape index: {}]   ;;  %s754_s5 = inlined_call_operand.hbm [shape: f32[2], index: 5, kind: output, shape index: {}]  }
   0x1   :  { %13 = vsyncpa [#allocation7], 0  ;;  %s577_s18 = smov [#allocation5]   ;;  %s541_s22 = scalar_lea.hbm %s752_s3, 256 }
   0x2   :  { %s26_s19 = sshll.u32 %s577_s18, 4  ;;  %p542_p0 = scmp.ne.s32.totalorder %s752_s3, %s541_s22  ;;  %s27_s19 = int_to_ptr.vmem [resolvable:$true] %s26_s19 }
   0x3   :  { %p545_p1 = scmp.lt.u32.totalorder %s541_s22, %s752_s3 }
   0x5   :  { %p547_p2 = pnand %p545_p1, %p542_p0 }
   0x7   :  { %550 = shalt.err (!%p547_p2)
}
   0x8   :  { %s551_s27 = scalar_lea.vmem %s27_s19, 256  ;;  %p556_p4 = scmp.lt.s32.totalorder %s27_s19, %s27_s19 }
   0x9   :  { %p552_p3 = scmp.ne.s32.totalorder %s27_s19, %s551_s27  ;;  %p557_p5 = scmp.lt.s32.totalorder %s551_s27, %s551_s27 }
   0xb   :  { %p558_p6 = por %p557_p5, %p556_p4 }
   0xd   :  { %p559_p7 = pnand %p558_p6, %p552_p3 }
   0xf   :  { %562 = shalt.err (!%p559_p7)
}
  0x10   :  { %29 = dma.hbm_to_vmem [thread:$0]  %s752_s3, 256, %s27_s19, [#allocation6]  }
  0x11   :  { %573 = dma.done.wait [#allocation6], 256  }
  0x12   :  { %574 = vsyncadd [#allocation6], 4294967040  ;;  %v41_v0 = vlaneseq  ;;  %v637_v11 = vld [vmem:[%s751_s2] ss:$0 sm:$0xff]  ;;  %v210_v14 = vld [vmem:[#allocation5 + $0x8] sm:$0xff]  ;;  %v290_v54 = vstv %s749_s0  ;;  %s563_s17 = scalar_lea.hbm %s754_s5, 16 }
  0x13   :  { %275 = vmatprep.mubr.f32.mxu0 %v210_v14  ;;  %v578_v15 = vmov 1.0|1.0   ;;  %v209_v36 = vld [vmem:[#allocation5] sm:$0xff]  ;;  %p564_p8 = scmp.ne.s32.totalorder %s754_s5, %s563_s17  ;;  %p567_p9 = scmp.lt.u32.totalorder %s563_s17, %s754_s5 }
  0x14   :  { %v623_v1 = vshrl.u32 %v41_v0, 7  ;;  %v293_v37 = vld [vmem:[%s753_s4] sm:$0xff]  ;;  %v289_v53 = vand.u32 127, %v41_v0 }
  0x15   :  { %v312_v38 = vmul.f32 0.5, %v293_v37  ;;  %p569_p10 = pnand %p567_p9, %p564_p8 }
  0x16   :  { %v58_v2 = vadd.s32 128, %v623_v1  ;;  %v59_v3 = vadd.s32 136, %v623_v1  ;;  %v43_v4 = vadd.s32 8, %v623_v1  ;;  %v60_v5 = vadd.s32 144, %v623_v1 }
  0x17   :  { %v61_v6 = vadd.s32 152, %v623_v1  ;;  %v44_v7 = vadd.s32 16, %v623_v1  ;;  %v45_v8 = vadd.s32 24, %v623_v1  ;;  %v62_v9 = vadd.s32 160, %v623_v1 }
  0x18   :  { %v63_v10 = vadd.s32 168, %v623_v1  ;;  %v46_v12 = vadd.s32 32, %v623_v1  ;;  %v47_v13 = vadd.s32 40, %v623_v1  ;;  %vm128_vm0 = vcmp.eq.s32.totalorder %v58_v2, %v637_v11 }
  0x19   :  { %vm129_vm1 = vcmp.eq.s32.totalorder %v59_v3, %v637_v11  ;;  %vm112_vm2 = vcmp.eq.s32.totalorder %v623_v1, %v637_v11  ;;  %vm113_vm3 = vcmp.eq.s32.totalorder %v43_v4, %v637_v11  ;;  %vm130_vm5 = vcmp.eq.s32.totalorder %v60_v5, %v637_v11 }
  0x1a   :  { %vm498_vm4 = vmpackc.low %vm129_vm1, %vm128_vm0  ;;  %vm131_vm6 = vcmp.eq.s32.totalorder %v61_v6, %v637_v11  ;;  %vm114_vm7 = vcmp.eq.s32.totalorder %v44_v7, %v637_v11  ;;  %vm115_vm8 = vcmp.eq.s32.totalorder %v45_v8, %v637_v11  ;;  %vm132_vm10 = vcmp.eq.s32.totalorder %v62_v9, %v637_v11 }
  0x1b   :  { %499 = vmatprep.subr.msk.bf16.mxu0 %vm498_vm4, %v578_v15  ;;  %vm500_vm9 = vmpackc.low %vm113_vm3, %vm112_vm2  ;;  %vm133_vm11 = vcmp.eq.s32.totalorder %v63_v10, %v637_v11  ;;  %v64_v16 = vadd.s32 176, %v623_v1  ;;  %v65_v17 = vadd.s32 184, %v623_v1  ;;  %vm116_vm15 = vcmp.eq.s32.totalorder %v46_v12, %v637_v11 }
  0x1c   :  { %501 = vmatpush3.bf16.msk.msra.mxu0 %vm500_vm9, %v578_v15  ;;  %vm502_vm12 = vmpackc.low %vm131_vm6, %vm130_vm5  ;;  %vm117_vm0 = vcmp.eq.s32.totalorder %v47_v13, %v637_v11  ;;  %v48_v18 = vadd.s32 48, %v623_v1  ;;  %v49_v19 = vadd.s32 56, %v623_v1  ;;  %v66_v20 = vadd.s32 192, %v623_v1 }
  0x1d   :  { %503 = vmatprep.subr.msk.bf16.mxu0 %vm502_vm12, %v578_v15  ;;  %vm504_vm13 = vmpackc.low %vm115_vm8, %vm114_vm7  ;;  %vm134_vm1 = vcmp.eq.s32.totalorder %v64_v16, %v637_v11  ;;  %vm135_vm2 = vcmp.eq.s32.totalorder %v65_v17, %v637_v11  ;;  %v67_v21 = vadd.s32 200, %v623_v1  ;;  %v50_v22 = vadd.s32 64, %v623_v1 }
  0x1e   :  { %vm506_vm14 = vmpackc.low %vm133_vm11, %vm132_vm10  ;;  %vm118_vm5 = vcmp.eq.s32.totalorder %v48_v18, %v637_v11  ;;  %vm119_vm6 = vcmp.eq.s32.totalorder %v49_v19, %v637_v11  ;;  %v51_v23 = vadd.s32 72, %v623_v1  ;;  %vm136_vm7 = vcmp.eq.s32.totalorder %v66_v20, %v637_v11 }
  0x1f   :  { %vm508_vm3 = vmpackc.low %vm117_vm0, %vm116_vm15  ;;  %vm137_vm8 = vcmp.eq.s32.totalorder %v67_v21, %v637_v11  ;;  %v68_v24 = vadd.s32 208, %v623_v1  ;;  %v69_v25 = vadd.s32 216, %v623_v1  ;;  %vm120_vm11 = vcmp.eq.s32.totalorder %v50_v22, %v637_v11 }
  0x20   :  { %505 = vmatpush3.bf16.msk.msra.mxu0 %vm504_vm13, %v578_v15  ;;  %vm510_vm4 = vmpackc.low %vm135_vm2, %vm134_vm1  ;;  %vm121_vm12 = vcmp.eq.s32.totalorder %v51_v23, %v637_v11  ;;  %v52_v26 = vadd.s32 80, %v623_v1  ;;  %v53_v27 = vadd.s32 88, %v623_v1  ;;  %v70_v28 = vadd.s32 224, %v623_v1 }
  0x21   :  { %507 = vmatprep.subr.msk.bf16.mxu0 %vm506_vm14, %v578_v15  ;;  %vm512_vm9 = vmpackc.low %vm119_vm6, %vm118_vm5  ;;  %vm138_vm13 = vcmp.eq.s32.totalorder %v68_v24, %v637_v11  ;;  %vm139_vm14 = vcmp.eq.s32.totalorder %v69_v25, %v637_v11  ;;  %v71_v29 = vadd.s32 232, %v623_v1  ;;  %v54_v30 = vadd.s32 96, %v623_v1 }
  0x22   :  { %vm514_vm10 = vmpackc.low %vm137_vm8, %vm136_vm7  ;;  %vm122_vm1 = vcmp.eq.s32.totalorder %v52_v26, %v637_v11  ;;  %vm123_vm2 = vcmp.eq.s32.totalorder %v53_v27, %v637_v11  ;;  %v55_v31 = vadd.s32 104, %v623_v1  ;;  %v72_v32 = vadd.s32 240, %v623_v1 }
  0x23   :  { %vm516_vm15 = vmpackc.low %vm121_vm12, %vm120_vm11  ;;  %v73_v33 = vadd.s32 248, %v623_v1  ;;  %vm124_vm7 = vcmp.eq.s32.totalorder %v54_v30, %v637_v11  ;;  %v56_v34 = vadd.s32 112, %v623_v1  ;;  %v57_v35 = vadd.s32 120, %v623_v1 }
  0x24   :  { %509 = vmatpush3.bf16.msk.msra.mxu0 %vm508_vm3, %v578_v15  ;;  %vm518_vm0 = vmpackc.low %vm139_vm14, %vm138_vm13  ;;  %vm140_vm3 = vcmp.eq.s32.totalorder %v70_v28, %v637_v11  ;;  %vm125_vm8 = vcmp.eq.s32.totalorder %v55_v31, %v637_v11  ;;  %v314_v39 = vrot.slane %v312_v38, 2 }
  0x25   :  { %511 = vmatprep.subr.msk.bf16.mxu0 %vm510_vm4, %v578_v15  ;;  %vm141_vm4 = vcmp.eq.s32.totalorder %v71_v29, %v637_v11  ;;  %vm520_vm5 = vmpackc.low %vm123_vm2, %vm122_vm1  ;;  %vm126_vm13 = vcmp.eq.s32.totalorder %v56_v34, %v637_v11  ;;  %vm127_vm14 = vcmp.eq.s32.totalorder %v57_v35, %v637_v11  ;;  %vm355_vm1 = vcmask 1040384  }
  0x26   :  { %vm522_vm6 = vmpackc.low %vm141_vm4, %vm140_vm3  ;;  %v316_v43 = vsub.f32 %v293_v37, %v314_v39  ;;  %v317_v44 = vadd.f32 %v314_v39, %v293_v37 }
  0x27   :  { %vm524_vm11 = vmpackc.low %vm125_vm8, %vm124_vm7 }
  0x28   :  { %513 = vmatpush3.bf16.msk.msra.mxu0 %vm512_vm9, %v578_v15  ;;  %vm142_vm9 = vcmp.eq.s32.totalorder %v72_v32, %v637_v11  ;;  %v323_v49 = vsub.f32 %v317_v44, %v316_v43 }
  0x29   :  { %515 = vmatprep.subr.msk.bf16.mxu0 %vm514_vm10, %v578_v15  ;;  %vm143_vm10 = vcmp.eq.s32.totalorder %v73_v33, %v637_v11 }
  0x2a   :  { %vm526_vm12 = vmpackc.low %vm143_vm10, %vm142_vm9  ;;  %v325_v60 = vrot.slane %v323_v49, 1 }
  0x2c   :  { %517 = vmatpush3.bf16.msk.msra.mxu0 %vm516_vm15, %v578_v15  ;;  %vm528_vm15 = vmpackc.low %vm127_vm14, %vm126_vm13  ;;  %v327_v8 = vmul.f32 %v325_v60, %v323_v49 }
  0x2d   :  { %519 = vmatprep.subr.msk.bf16.mxu0 %vm518_vm0, %v578_v15  ;;  %vm717_vm0 = vcmp.lt.s32.totalorder %v289_v53, %v290_v54 }
  0x30   :  { %521 = vmatpush3.bf16.msk.msra.mxu0 %vm520_vm5, %v578_v15 }
  0x31   :  { %523 = vmatprep.subr.msk.bf16.mxu0 %vm522_vm6, %v578_v15 }
  0x34   :  { %525 = vmatpush3.bf16.msk.msra.mxu0 %vm524_vm11, %v578_v15 }
  0x35   :  { %527 = vmatprep.subr.msk.bf16.mxu0 %vm526_vm12, %v578_v15 }
  0x38   :  { %529 = vmatpush3.bf16.msk.msra.mxu0 %vm528_vm15, %v578_v15 }
  0x3b   :  { %276 = vmatmul.mubr.f32.vlgmr.msra.gmra.mrb[0].mxu0 %v209_v36 }
 0x10e   :  { %v495_v40 = vpop.f32.mrb[0].mxu0 }
 0x10f   :  { %v496_v41 = vpop.f32.mrb[1].mxu0 }
 0x110   :  { %v497_v42 = vadd.f32 %v496_v41, %v495_v40 }
 0x112   :  { %v294_v45 = vsub.f32 %v497_v42, %v293_v37  ;;  %v306_v46 = vmul.f32 0.5, %v497_v42 }
 0x114   :  { %v295_v47 = vand.u32 2147483647, %v294_v45  ;;  %v308_v48 = vrot.slane %v306_v46, 2 }
 0x116   :  { %v310_v50 = vsub.f32 %v497_v42, %v308_v48  ;;  %v311_v51 = vadd.f32 %v497_v42, %v308_v48  ;;  %v297_v52 = vrot.slane %v295_v47, 1  ;;  %v300_v55 = vrot.slane %v295_v47, 2 }
 0x117   :  { %v303_v2 = vrot.slane %v295_v47, 3 }
 0x118   :  { %v318_v56 = vsub.f32 %v311_v51, %v310_v50  ;;  %v338_v57 = vmax.f32 %v311_v51, %v317_v44  ;;  %v339_v58 = vmin.f32 %v310_v50, %v316_v43  ;;  %v299_v59 = vadd.f32 %v297_v52, %v295_v47 }
 0x119   :  { %v328_v61 = vmin.f32 %v311_v51, %v317_v44  ;;  %v329_v62 = vmax.f32 %v310_v50, %v316_v43 }
 0x11a   :  { %v320_v63 = vrot.slane %v318_v56, 1  ;;  %v302_v1 = vadd.f32 %v300_v55, %v299_v59  ;;  %v340_v3 = vsub.f32 %v338_v57, %v339_v58 }
 0x11b   :  { %v330_v0 = vsub.f32 %v328_v61, %v329_v62 }
 0x11c   :  { %v305_v5 = vadd.f32 %v303_v2, %v302_v1  ;;  %v341_v6 = vmax.f32 %v340_v3, 0.0  ;;  %v322_v7 = vmul.f32 %v320_v63, %v318_v56 }
 0x11d   :  { %v331_v9 = vmax.f32 %v330_v0, 0.0 }
 0x11e   :  { %v343_v10 = vrot.slane %v341_v6, 1  ;;  %v354_v11 = vsel %vm717_vm0, %v305_v5, 0.0  ;;  %v336_v16 = vadd.f32 %v327_v8, %v322_v7 }
 0x11f   :  { %v356_v12 = vsel %vm355_vm1, %v354_v11, 0.0  ;;  %v333_v13 = vrot.slane %v331_v9, 1 }
 0x120   :  { %v345_v14 = vmul.f32 %v343_v10, %v341_v6  ;;  %357 = vadd.xlane.f32.xlu0 %v356_v12 }
 0x121   :  { %v335_v15 = vmul.f32 %v333_v13, %v331_v9 }
 0x122   :  { %v347_v17 = vsel %vm717_vm0, %v345_v14, 1.0 }
 0x123   :  { %v337_v18 = vsub.f32 %v336_v16, %v335_v15  ;;  %537 = vrcp.f32 %v347_v17 }
 0x125   :  { %v346_v19 = vsel %vm717_vm0, %v337_v18, 1.0 }
 0x126   :  { %539 = vrcp.f32 %v346_v19  ;;  %v350_v21 = vsub.f32 %v347_v17, %v346_v19 }
 0x12d   :  { %v538_v20 = vpop.eup %537 }
 0x12e   :  { %v352_v24 = vmul.f32 %v538_v20, %v350_v21 }
 0x130   :  { %v540_v22 = vpop.eup %539 }
 0x131   :  { %v349_v23 = vmul.f32 %v540_v22, %v335_v15 }
 0x133   :  { %v353_v25 = vsub.f32 %v349_v23, %v352_v24 }
 0x135   :  { %v369_v26 = vsub.f32 1.0, %v353_v25 }
 0x137   :  { %v370_v27 = vsel %vm717_vm0, %v369_v26, 0.0 }
 0x138   :  { %v371_v28 = vsel %vm355_vm1, %v370_v27, 0.0 }
 0x139   :  { %372 = vadd.xlane.f32.xlu0 %v371_v28 }
 0x1ad   :  { %v358_v29 = vpop.xlane.xlu0 %357 }
 0x1ae   :  { %v359_v30 = vrot.slane %v358_v29, 4 }
 0x1b0   :  { %v360_v31 = vadd.f32 %v359_v30, %v358_v29 }
 0x1b2   :  { %v361_v32 = vrot.slane %v360_v31, 2 }
 0x1b4   :  { %v362_v33 = vadd.f32 %v361_v32, %v360_v31 }
 0x1b6   :  { %v363_v34 = vrot.slane %v362_v33, 1 }
 0x1b8   :  { %v364_v35 = vadd.f32 %v363_v34, %v362_v33 }
 0x1ba   :  { %530 = vpush %v364_v35 }
 0x1c6   :  { %v373_v36 = vpop.xlane.xlu0 %372 }
 0x1c7   :  { %v374_v37 = vrot.slane %v373_v36, 4 }
 0x1c9   :  { %v375_v38 = vadd.f32 %v374_v37, %v373_v36 }
 0x1cb   :  { %v376_v39 = vrot.slane %v375_v38, 2 }
 0x1cd   :  { %v377_v40 = vadd.f32 %v376_v39, %v375_v38 }
 0x1cf   :  { %v378_v41 = vrot.slane %v377_v40, 1 }
 0x1d1   :  { %v379_v42 = vadd.f32 %v378_v41, %v377_v40 }
 0x1d3   :  { %532 = vpush %v379_v42 }
 0x1eb   :  { %s531_s0 = spop %530 }
 0x1ec   :  { %s366_s10 = smul.f32 %s531_s0, %s750_s1 }
 0x1ee   :  { %368 = sst [smem:[#allocation8]] %s366_s10 }
 0x204   :  { %s533_s11 = spop %532 }
 0x205   :  { %s381_s14 = smul.f32 %s533_s11, %s750_s1 }
 0x207   :  { %383 = sst [smem:[#allocation8 + $0x1]] %s381_s14 }
 0x208   :  { %572 = shalt.err (!%p569_p10)
}
 0x209   :  { %s579_s22 = smov [#allocation8]  }
 0x20a   :  { %391 = dma.smem_to_hbm %s579_s22, 16, %s754_s5, [#allocation7]  }
 0x20b   :  { %575 = dma.done.wait [#allocation7], 16  }
 0x20c   :  { %576 = vsyncadd [#allocation7], 4294967280 }
 0x20d   :  { %395 = sfence }
 0x20e   :  { %396 = vsyncpa [#allocation6], 1 }
 0x20f   :  { %397 = vsyncpa [#allocation7], 1 }

</bundles_post_ra>
